<compile_context>
chip_gen: v7x
topology: tpu7x:2x2x1
jax: 0.10.0
libtpu: 0.0.40
codegen_flags: <defaults>
</compile_context>

<pallas_src>
import math
import functools

import jax
import jax.numpy as jnp
from jax.experimental import pallas as pl
from jax.experimental.pallas import tpu as pltpu


def _round_up(x, m):
    return ((x + m - 1) // m) * m


# ----------------------------------------------------------------------------
# Pallas kernel: fused (patches @ W + bias) followed by LayerNorm over E.
# ----------------------------------------------------------------------------
def _patch_embed_kernel(patches_ref, w_ref, b_ref, gamma_ref, beta_ref, o_ref,
                        *, eps: float):
    # patches_ref: (TN, K)  bf16 token tile (K = C*KH*KW, full extent, no pad)
    # w_ref:       (K, E)   bf16 projection weight (grid-invariant)
    # b_ref / gamma_ref / beta_ref: (1, E) f32
    # o_ref:       (TN, E)  output dtype (bf16 by default)
    acc = jnp.dot(patches_ref[...], w_ref[...],
                  preferred_element_type=jnp.float32)          # MXU, f32 acc
    acc = acc + b_ref[...]                                      # conv bias

    # LayerNorm over the true (unpadded) embed dim; two-pass variance in f32.
    inv_e = 1.0 / acc.shape[-1]
    mean = jnp.sum(acc, axis=-1, keepdims=True) * inv_e
    centered = acc - mean
    var = jnp.sum(centered * centered, axis=-1, keepdims=True) * inv_e
    normed = centered * jax.lax.rsqrt(var + eps)                # rsqrt on EUP
    o_ref[...] = (normed * gamma_ref[...] + beta_ref[...]).astype(o_ref.dtype)


# ----------------------------------------------------------------------------
# Wrapper glue.
# ----------------------------------------------------------------------------
def _extract_patches(x, kh, kw, stride, pad_h, pad_w, dtype):
    """(B, C, H, W) -> ((B*H_out*W_out, C*KH*KW), H_out, W_out), no gathers."""
    # Only the raw image gets transposed (tiny); the expanded patch matrix is
    # emitted directly in (token, c*kh*kw) order by the XLA patch-extraction
    # conv, so no extra transpose pass over the big buffer.
    x_nhwc = jnp.transpose(x, (0, 2, 3, 1)).astype(dtype)
    patches = jax.lax.conv_general_dilated_patches(
        x_nhwc,
        filter_shape=(kh, kw),
        window_strides=(stride, stride),
        padding=((pad_h, pad_h), (pad_w, pad_w)),
        dimension_numbers=("NHWC", "HWIO", "NHWC"))
    b, h_out, w_out, k = patches.shape          # feature order = (c, kh, kw)
    return patches.reshape(b * h_out * w_out, k), h_out, w_out


def _choose_tile_n(n, tile_n):
    # Multiple of 16 (bf16 sublane packing); big tiles amortize grid-step cost.
    tn = max(16, min(tile_n, _round_up(n, 16)))
    # Ensure >= 2 token tiles so dimension_semantics="parallel" can actually
    # split the grid across v7x's two TensorCores (no-op on v5e/v6e).
    if n > 16 and pl.cdiv(n, tn) < 2:
        tn = max(16, _round_up(pl.cdiv(n, 2), 16))
    return tn


def _vmem_limit_bytes(tn, k, e, out_bytes):
    kp, ep = _round_up(k, 128), _round_up(e, 128)
    need = (2 * tn * kp * 2            # double-buffered patch tiles (bf16)
            + 2 * tn * ep * out_bytes  # double-buffered output tiles
            + 2 * kp * ep * 2          # weight (budget 2x even if Buffered(1))
            + 6 * ep * 4               # bias / gamma / beta
            + (4 << 20))               # compiler scratch headroom
    try:
        cap = int(pltpu.get_tpu_info().vmem_capacity_bytes)
    except Exception:
        cap = 64 << 20                 # v7x per-core VMEM = safe lower bound
    return int(min(max(need, 16 << 20), cap - (12 << 20)))


def overlap_patch_embed(x, conv_w, conv_b, ln_w, ln_b, *, stride, eps=1e-5,
                        tile_n=1024, out_dtype=jnp.bfloat16):
    """Forward pass of OverlapPatchEmbed.

    x:       (B, C, H, W)    NCHW, like PyTorch.
    conv_w:  (E, C, KH, KW)  PyTorch Conv2d weight layout.
    conv_b, ln_w, ln_b: (E,)
    Returns (y, H_out, W_out) with y of shape (B, H_out*W_out, E) in
    `out_dtype` (pass jnp.float32 to match the PyTorch output dtype exactly).
    """
    B, C, H, W = x.shape
    E, Cw, KH, KW = conv_w.shape
    assert Cw == C
    pad_h, pad_w = KH // 2, KW // 2

    # Patch matrix: N = B*H_out*W_out tokens, K = C*KH*KW features, bf16.
    patches, H_out, W_out = _extract_patches(x, KH, KW, stride, pad_h, pad_w,
                                             jnp.bfloat16)
    N, K = patches.shape

    # (E, C, KH, KW) -> (K, E); feature ordering (c, kh, kw) matches patches.
    w_mat = jnp.transpose(conv_w.reshape(E, K)).astype(jnp.bfloat16)
    b2d = conv_b.reshape(1, E).astype(jnp.float32)
    g2d = ln_w.reshape(1, E).astype(jnp.float32)
    be2d = ln_b.reshape(1, E).astype(jnp.float32)

    TN = _choose_tile_n(N, tile_n)
    grid = (pl.cdiv(N, TN),)        # ragged last tile -> masked stores
    out_bytes = jnp.dtype(out_dtype).itemsize

    kernel = functools.partial(_patch_embed_kernel, eps=eps)
    cost = pl.CostEstimate(
        flops=2 * N * K * E,
        transcendentals=N,                       # one rsqrt per token row
        bytes_accessed=N * K * 2 + K * E * 2 + N * E * out_bytes + 3 * E * 4)
    params = pltpu.CompilerParams(
        dimension_semantics=("parallel",),
        vmem_limit_bytes=_vmem_limit_bytes(TN, K, E, out_bytes))

    def call(single_buffer_consts):
        kwargs = {}
        if single_buffer_consts:
            # Grid-invariant operands -> single VMEM buffer (halves their
            # footprint; matters on v7x's 64 MiB for the larger PVT stages).
            kwargs = dict(pipeline_mode=pl.Buffered(1))

        def const_spec(shape):
            return pl.BlockSpec(shape, lambda i: (0, 0), **kwargs)

        return pl.pallas_call(
            kernel,
            out_shape=jax.ShapeDtypeStruct((N, E), out_dtype),
            grid=grid,
            in_specs=[
                pl.BlockSpec((TN, K), lambda i: (i, 0)),  # streamed token tiles
                const_spec((K, E)),                       # resident weight
                const_spec((1, E)),                       # bias
                const_spec((1, E)),                       # gamma
                const_spec((1, E)),                       # beta
            ],
            out_specs=pl.BlockSpec((TN, E), lambda i: (i, 0)),
            compiler_params=params,
            cost_estimate=cost,
        )(patches, w_mat, b2d, g2d, be2d)

    try:
        y = call(True)
    except Exception:
        # Fallback for JAX versions without pipeline_mode / Buffered(1) support
        # on the outer pallas_call pipeline.
        y = call(False)

    # Reshape is free (contiguous); no post-kernel slice pass anymore.
    return y.reshape(B, H_out * W_out, E), H_out, W_out


# ----------------------------------------------------------------------------
# Pure-JAX reference (mirrors the PyTorch forward) for a correctness check.
# ----------------------------------------------------------------------------
def _reference(x, conv_w, conv_b, ln_w, ln_b, *, stride, eps=1e-5):
    KH, KW = conv_w.shape[2], conv_w.shape[3]
    y = jax.lax.conv_general_dilated(
        x.astype(jnp.float32), conv_w.astype(jnp.float32),
        window_strides=(stride, stride),
        padding=((KH // 2, KH // 2), (KW // 2, KW // 2)),
        dimension_numbers=("NCHW", "OIHW", "NCHW"))
    y = y + conv_b.reshape(1, -1, 1, 1)
    B, E, Ho, Wo = y.shape
    y = y.reshape(B, E, Ho * Wo).transpose(0, 2, 1)        # (B, L, E)
    mean = jnp.mean(y, axis=-1, keepdims=True)
    var = jnp.mean((y - mean) ** 2, axis=-1, keepdims=True)
    y = (y - mean) * jax.lax.rsqrt(var + eps) * ln_w + ln_b
    return y, Ho, Wo


if __name__ == "__main__":
    # Small, self-consistent shapes: img 16x16, patch 7, stride 4, C=4, E=32.
    B, C, Himg, Wimg = 2, 4, 16, 16
    patch_size, stride, embed_dim = 7, 4, 32

    key = jax.random.PRNGKey(0)
    kx, kw = jax.random.split(key)

    x = jax.random.normal(kx, (B, C, Himg, Wimg), dtype=jnp.float32)

    # Conv2d init: normal(0, sqrt(2 / fan_out)), bias = 0.
    fan_out = patch_size * patch_size * embed_dim
    conv_w = jax.random.normal(
        kw, (embed_dim, C, patch_size, patch_size),
        dtype=jnp.float32) * math.sqrt(2.0 / fan_out)
    conv_b = jnp.zeros((embed_dim,), dtype=jnp.float32)

    # LayerNorm init: weight = 1, bias = 0.
    ln_w = jnp.ones((embed_dim,), dtype=jnp.float32)
    ln_b = jnp.zeros((embed_dim,), dtype=jnp.float32)

    y, Ho, Wo = overlap_patch_embed(x, conv_w, conv_b, ln_w, ln_b,
                                    stride=stride)
    jax.block_until_ready(y)

    y_ref, Ho_ref, Wo_ref = _reference(x, conv_w, conv_b, ln_w, ln_b,
                                       stride=stride)
    assert (Ho, Wo) == (Ho_ref, Wo_ref)
    assert y.shape == (B, Ho * Wo, embed_dim)
    # bf16 MXU inputs + bf16 output -> looser tolerance than a pure-f32 path.
    assert jnp.allclose(y.astype(jnp.float32), y_ref, atol=5e-2, rtol=5e-2)

    print("KERNEL_OK")
</pallas_src>

<mosaic_0001>
module attributes {stable_mosaic.version = 11 : i64} {
  func.func @_patch_embed_kernel(%arg0: i32, %arg1: memref<16x196xbf16, #tpu.memory_space<vmem>>, %arg2: memref<196x32xbf16, #tpu.memory_space<vmem>>, %arg3: memref<1x32xf32, #tpu.memory_space<vmem>>, %arg4: memref<1x32xf32, #tpu.memory_space<vmem>>, %arg5: memref<1x32xf32, #tpu.memory_space<vmem>>, %arg6: memref<16x32xbf16, #tpu.memory_space<vmem>>) attributes {dimension_semantics = [#tpu.dimension_semantics<parallel>], iteration_bounds = array<i64: 2>, scalar_prefetch = 0 : i64, scratch_operands = 0 : i64, tpu.core_type = #tpu.core_type<tc>, window_params = [{transform_indices = @transform_0, window_bounds = array<i64: 16, 196>}, {pipeline_mode = #tpu.pipeline_mode<synchronous>, transform_indices = @transform_1, window_bounds = array<i64: 196, 32>}, {pipeline_mode = #tpu.pipeline_mode<synchronous>, transform_indices = @transform_2, window_bounds = array<i64: 1, 32>}, {pipeline_mode = #tpu.pipeline_mode<synchronous>, transform_indices = @transform_3, window_bounds = array<i64: 1, 32>}, {pipeline_mode = #tpu.pipeline_mode<synchronous>, transform_indices = @transform_4, window_bounds = array<i64: 1, 32>}, {transform_indices = @transform_5, window_bounds = array<i64: 16, 32>}]} {
    %c0 = arith.constant 0 : index
    %c0_0 = arith.constant 0 : index
    %0 = vector.load %arg1[%c0, %c0_0] : memref<16x196xbf16, #tpu.memory_space<vmem>>, vector<16x196xbf16>
    %c0_1 = arith.constant 0 : index
    %c0_2 = arith.constant 0 : index
    %1 = vector.load %arg2[%c0_1, %c0_2] : memref<196x32xbf16, #tpu.memory_space<vmem>>, vector<196x32xbf16>
    %cst = arith.constant dense<0.000000e+00> : vector<16x32xf32>
    %2 = tpu.matmul %0, %1, %cst {dimension_numbers = #tpu.dot_dimension_numbers<[1], [0], [0], [1], [0, 0, 1, 1], [], []>} : vector<16x196xbf16>, vector<196x32xbf16>, vector<16x32xf32> -> vector<16x32xf32>
    %c0_3 = arith.constant 0 : index
    %c0_4 = arith.constant 0 : index
    %3 = vector.load %arg3[%c0_3, %c0_4] : memref<1x32xf32, #tpu.memory_space<vmem>>, vector<1x32xf32>
    %4 = vector.broadcast %3 : vector<1x32xf32> to vector<16x32xf32>
    %5 = arith.addf %2, %4 : vector<16x32xf32>
    %cst_5 = arith.constant dense<0.000000e+00> : vector<16xf32>
    %6 = vector.multi_reduction <add>, %5, %cst_5 [1] : vector<16x32xf32> to vector<16xf32>
    %7 = vector.shape_cast %6 : vector<16xf32> to vector<16x1xf32>
    %cst_6 = arith.constant 3.125000e-02 : f32
    %8 = vector.broadcast %cst_6 : f32 to vector<16x1xf32>
    %9 = arith.mulf %7, %8 : vector<16x1xf32>
    %10 = vector.broadcast %9 : vector<16x1xf32> to vector<16x32xf32>
    %11 = arith.subf %5, %10 : vector<16x32xf32>
    %12 = arith.mulf %11, %11 : vector<16x32xf32>
    %cst_7 = arith.constant dense<0.000000e+00> : vector<16xf32>
    %13 = vector.multi_reduction <add>, %12, %cst_7 [1] : vector<16x32xf32> to vector<16xf32>
    %14 = vector.shape_cast %13 : vector<16xf32> to vector<16x1xf32>
    %cst_8 = arith.constant 3.125000e-02 : f32
    %15 = vector.broadcast %cst_8 : f32 to vector<16x1xf32>
    %16 = arith.mulf %14, %15 : vector<16x1xf32>
    %cst_9 = arith.constant 9.99999974E-6 : f32
    %17 = vector.broadcast %cst_9 : f32 to vector<16x1xf32>
    %18 = arith.addf %16, %17 : vector<16x1xf32>
    %19 = math.rsqrt %18 : vector<16x1xf32>
    %20 = vector.broadcast %19 : vector<16x1xf32> to vector<16x32xf32>
    %21 = arith.mulf %11, %20 : vector<16x32xf32>
    %c0_10 = arith.constant 0 : index
    %c0_11 = arith.constant 0 : index
    %22 = vector.load %arg4[%c0_10, %c0_11] : memref<1x32xf32, #tpu.memory_space<vmem>>, vector<1x32xf32>
    %23 = vector.broadcast %22 : vector<1x32xf32> to vector<16x32xf32>
    %24 = arith.mulf %21, %23 : vector<16x32xf32>
    %c0_12 = arith.constant 0 : index
    %c0_13 = arith.constant 0 : index
    %25 = vector.load %arg5[%c0_12, %c0_13] : memref<1x32xf32, #tpu.memory_space<vmem>>, vector<1x32xf32>
    %26 = vector.broadcast %25 : vector<1x32xf32> to vector<16x32xf32>
    %27 = arith.addf %24, %26 : vector<16x32xf32>
    %28 = arith.truncf %27 : vector<16x32xf32> to vector<16x32xbf16>
    %c0_14 = arith.constant 0 : index
    %c0_15 = arith.constant 0 : index
    %29 = vector.load %arg6[%c0_14, %c0_15] : memref<16x32xbf16, #tpu.memory_space<vmem>>, vector<16x32xbf16>
    tpu.vector_store %arg6[%c0_14, %c0_15], %28 {strides = array<i32>} : memref<16x32xbf16, #tpu.memory_space<vmem>>, vector<16x32xbf16>,
    return
  }
  func.func @transform_0(%arg0: i32) -> (i32, i32) {
    %c0_i32 = arith.constant 0 : i32
    %c0_i32_0 = arith.constant 0 : i32
    return %arg0, %c0_i32 : i32, i32
  }
  func.func @transform_1(%arg0: i32) -> (i32, i32) {
    %c0_i32 = arith.constant 0 : i32
    %c0_i32_0 = arith.constant 0 : i32
    %c0_i32_1 = arith.constant 0 : i32
    return %c0_i32, %c0_i32_0 : i32, i32
  }
  func.func @transform_2(%arg0: i32) -> (i32, i32) {
    %c0_i32 = arith.constant 0 : i32
    %c0_i32_0 = arith.constant 0 : i32
    %c0_i32_1 = arith.constant 0 : i32
    return %c0_i32, %c0_i32_0 : i32, i32
  }
  func.func @transform_3(%arg0: i32) -> (i32, i32) {
    %c0_i32 = arith.constant 0 : i32
    %c0_i32_0 = arith.constant 0 : i32
    %c0_i32_1 = arith.constant 0 : i32
    return %c0_i32, %c0_i32_0 : i32, i32
  }
  func.func @transform_4(%arg0: i32) -> (i32, i32) {
    %c0_i32 = arith.constant 0 : i32
    %c0_i32_0 = arith.constant 0 : i32
    %c0_i32_1 = arith.constant 0 : i32
    return %c0_i32, %c0_i32_0 : i32, i32
  }
  func.func @transform_5(%arg0: i32) -> (i32, i32) {
    %c0_i32 = arith.constant 0 : i32
    %c0_i32_0 = arith.constant 0 : i32
    return %arg0, %c0_i32 : i32, i32
  }
}

module attributes {stable_mosaic.version = 11 : i64} {
  func.func @_patch_embed_kernel(%arg0: i32, %arg1: memref<16x196xbf16, #tpu.memory_space<vmem>>, %arg2: memref<196x32xbf16, #tpu.memory_space<vmem>>, %arg3: memref<1x32xf32, #tpu.memory_space<vmem>>, %arg4: memref<1x32xf32, #tpu.memory_space<vmem>>, %arg5: memref<1x32xf32, #tpu.memory_space<vmem>>, %arg6: memref<16x32xbf16, #tpu.memory_space<vmem>>) attributes {dimension_semantics = [#tpu.dimension_semantics<parallel>], iteration_bounds = array<i64: 2>, scalar_prefetch = 0 : i64, scratch_operands = 0 : i64, tpu.core_type = #tpu.core_type<tc>, window_params = [{transform_indices = @transform_0, window_bounds = array<i64: 16, 196>}, {pipeline_mode = #tpu.pipeline_mode<synchronous>, transform_indices = @transform_1, window_bounds = array<i64: 196, 32>}, {pipeline_mode = #tpu.pipeline_mode<synchronous>, transform_indices = @transform_2, window_bounds = array<i64: 1, 32>}, {pipeline_mode = #tpu.pipeline_mode<synchronous>, transform_indices = @transform_3, window_bounds = array<i64: 1, 32>}, {pipeline_mode = #tpu.pipeline_mode<synchronous>, transform_indices = @transform_4, window_bounds = array<i64: 1, 32>}, {transform_indices = @transform_5, window_bounds = array<i64: 16, 32>}]} {
    %c0 = arith.constant 0 : index
    %c0_0 = arith.constant 0 : index
    %0 = vector.load %arg1[%c0, %c0_0] : memref<16x196xbf16, #tpu.memory_space<vmem>>, vector<16x196xbf16>
    %c0_1 = arith.constant 0 : index
    %c0_2 = arith.constant 0 : index
    %1 = vector.load %arg2[%c0_1, %c0_2] : memref<196x32xbf16, #tpu.memory_space<vmem>>, vector<196x32xbf16>
    %cst = arith.constant dense<0.000000e+00> : vector<16x32xf32>
    %2 = tpu.matmul %0, %1, %cst {dimension_numbers = #tpu.dot_dimension_numbers<[1], [0], [0], [1], [0, 0, 1, 1], [], []>} : vector<16x196xbf16>, vector<196x32xbf16>, vector<16x32xf32> -> vector<16x32xf32>
    %c0_3 = arith.constant 0 : index
    %c0_4 = arith.constant 0 : index
    %3 = vector.load %arg3[%c0_3, %c0_4] : memref<1x32xf32, #tpu.memory_space<vmem>>, vector<1x32xf32>
    %4 = vector.broadcast %3 : vector<1x32xf32> to vector<16x32xf32>
    %5 = arith.addf %2, %4 : vector<16x32xf32>
    %cst_5 = arith.constant dense<0.000000e+00> : vector<16xf32>
    %6 = vector.multi_reduction <add>, %5, %cst_5 [1] : vector<16x32xf32> to vector<16xf32>
    %7 = vector.shape_cast %6 : vector<16xf32> to vector<16x1xf32>
    %cst_6 = arith.constant 3.125000e-02 : f32
    %8 = vector.broadcast %cst_6 : f32 to vector<16x1xf32>
    %9 = arith.mulf %7, %8 : vector<16x1xf32>
    %10 = vector.broadcast %9 : vector<16x1xf32> to vector<16x32xf32>
    %11 = arith.subf %5, %10 : vector<16x32xf32>
    %12 = arith.mulf %11, %11 : vector<16x32xf32>
    %cst_7 = arith.constant dense<0.000000e+00> : vector<16xf32>
    %13 = vector.multi_reduction <add>, %12, %cst_7 [1] : vector<16x32xf32> to vector<16xf32>
    %14 = vector.shape_cast %13 : vector<16xf32> to vector<16x1xf32>
    %cst_8 = arith.constant 3.125000e-02 : f32
    %15 = vector.broadcast %cst_8 : f32 to vector<16x1xf32>
    %16 = arith.mulf %14, %15 : vector<16x1xf32>
    %cst_9 = arith.constant 9.99999974E-6 : f32
    %17 = vector.broadcast %cst_9 : f32 to vector<16x1xf32>
    %18 = arith.addf %16, %17 : vector<16x1xf32>
    %19 = math.rsqrt %18 : vector<16x1xf32>
    %20 = vector.broadcast %19 : vector<16x1xf32> to vector<16x32xf32>
    %21 = arith.mulf %11, %20 : vector<16x32xf32>
    %c0_10 = arith.constant 0 : index
    %c0_11 = arith.constant 0 : index
    %22 = vector.load %arg4[%c0_10, %c0_11] : memref<1x32xf32, #tpu.memory_space<vmem>>, vector<1x32xf32>
    %23 = vector.broadcast %22 : vector<1x32xf32> to vector<16x32xf32>
    %24 = arith.mulf %21, %23 : vector<16x32xf32>
    %c0_12 = arith.constant 0 : index
    %c0_13 = arith.constant 0 : index
    %25 = vector.load %arg5[%c0_12, %c0_13] : memref<1x32xf32, #tpu.memory_space<vmem>>, vector<1x32xf32>
    %26 = vector.broadcast %25 : vector<1x32xf32> to vector<16x32xf32>
    %27 = arith.addf %24, %26 : vector<16x32xf32>
    %28 = arith.truncf %27 : vector<16x32xf32> to vector<16x32xbf16>
    %c0_14 = arith.constant 0 : index
    %c0_15 = arith.constant 0 : index
    %29 = vector.load %arg6[%c0_14, %c0_15] : memref<16x32xbf16, #tpu.memory_space<vmem>>, vector<16x32xbf16>
    tpu.vector_store %arg6[%c0_14, %c0_15], %28 {strides = array<i32>} : memref<16x32xbf16, #tpu.memory_space<vmem>>, vector<16x32xbf16>,
    return
  }
  func.func @transform_0(%arg0: i32) -> (i32, i32) {
    %c0_i32 = arith.constant 0 : i32
    %c0_i32_0 = arith.constant 0 : i32
    return %arg0, %c0_i32 : i32, i32
  }
  func.func @transform_1(%arg0: i32) -> (i32, i32) {
    %c0_i32 = arith.constant 0 : i32
    %c0_i32_0 = arith.constant 0 : i32
    %c0_i32_1 = arith.constant 0 : i32
    return %c0_i32, %c0_i32_0 : i32, i32
  }
  func.func @transform_2(%arg0: i32) -> (i32, i32) {
    %c0_i32 = arith.constant 0 : i32
    %c0_i32_0 = arith.constant 0 : i32
    %c0_i32_1 = arith.constant 0 : i32
    return %c0_i32, %c0_i32_0 : i32, i32
  }
  func.func @transform_3(%arg0: i32) -> (i32, i32) {
    %c0_i32 = arith.constant 0 : i32
    %c0_i32_0 = arith.constant 0 : i32
    %c0_i32_1 = arith.constant 0 : i32
    return %c0_i32, %c0_i32_0 : i32, i32
  }
  func.func @transform_4(%arg0: i32) -> (i32, i32) {
    %c0_i32 = arith.constant 0 : i32
    %c0_i32_0 = arith.constant 0 : i32
    %c0_i32_1 = arith.constant 0 : i32
    return %c0_i32, %c0_i32_0 : i32, i32
  }
  func.func @transform_5(%arg0: i32) -> (i32, i32) {
    %c0_i32 = arith.constant 0 : i32
    %c0_i32_0 = arith.constant 0 : i32
    return %arg0, %c0_i32 : i32, i32
  }
}

</mosaic_0001>

<bundles_post_ra>
// kernel: tpu_custom_call.1
= control target key start
LH: loop header
LB: loop body
LE: loop exit
PB: predicated region body
PF: predicated region fallthrough
CT: control target
= control target key end

     0   :  { %10 = vsyncpa [#allocation3], 0  ;;  %s885_s0 = inlined_call_operand.vmem [shape: bf16[32,196], index: 0, kind: input, shape index: {}]   ;;  %s886_s1 = inlined_call_operand.vmem [shape: bf16[196,32], index: 1, kind: input, shape index: {}]   ;;  %s887_s2 = inlined_call_operand.vmem [shape: f32[1,32], index: 2, kind: input, shape index: {}]   ;;  %s888_s3 = inlined_call_operand.vmem [shape: f32[1,32], index: 3, kind: input, shape index: {}]   ;;  %s889_s4 = inlined_call_operand.vmem [shape: f32[1,32], index: 4, kind: input, shape index: {}]   ;;  %s890_s5 = inlined_call_operand.hbm [shape: bf16[32,32], index: 5, kind: output, shape index: {}]  }
   0x1   :  { %12 = vsyncpa [#allocation3 + $0x1], 0  ;;  %s727_s18 = smov 0   ;;  %s729_s19 = smov 0  }
   0x2   :  { %s731_s20 = smov 0   ;;  %s733_s21 = smov 0  }
   0x3 LB: > { %s748_s22 = sadd.s32 4294967295, %s691_s21   ;;  %s529_s23 = sadd.s32 4294967294, %s691_s21   ;;  %s691_s21 = sphi %s733_s21, %s896_s21   ;;  %s687_s20 = sphi %s731_s20, %s895_s20   ;;  %s683_s19 = sphi %s729_s19, %s894_s19   ;;  %s679_s18 = sphi %s727_s18, %s893_s18  }
   0x4   : > { %s752_s24 = sadd.s32 1, %s691_s21   ;;  %s135_s25 = sadd.s32 1, %s687_s20 }
   0x5   : > { %s132_s26 = ssub.s32 %s691_s21, %s752_s24  ;;  %p145_p0 = scmp.ne.s32.totalorder %s687_s20, %s683_s19 }
   0x6   : > { %p133_p1 = scmp.eq.s32.totalorder %s132_s26, 0  ;;  %p146_p2 = scmp.eq.s32.totalorder %s748_s22, 1 }
   0x7   : > { %p151_p3 = scmp.ne.s32.totalorder %s683_s19, %s679_s18  ;;  %p152_p4 = scmp.eq.s32.totalorder %s529_s23, 1 }
   0x8   : > { %s763_s27 = scalar_select %p133_p1, %s687_s20, %s135_s25  }
   0x9   : > { %p765_p5 = por %p146_p2, %p145_p0  ;;  %p769_p6 = por %p152_p4, %p151_p3 }
   0xa   : > { %p532_p7 = scmp.ge.s32.totalorder %s691_s21, 1  ;;  %p192_p8 = scmp.lt.s32.totalorder %s691_s21, 3 }
   0xc   : > { %p193_p9 = pnand %p532_p7, %p192_p8 }
   0xd   : > { %v609_v0 = vld [vmem:[%s886_s1] sm:$0xff] (!%p193_p9)   ;;  %v693_v1 = vmov (!%p193_p9), 0   ;;  %v610_v2 = vld [vmem:[%s886_s1 + $0x8] sm:$0xff] (!%p193_p9)   ;;  %s534_s9 = sshll.u32 (!%p193_p9), %s748_s22, 1  ;;  %v611_v3 = vld [vmem:[%s886_s1 + $0x10] sm:$0xff] (!%p193_p9)   ;;  %vm348_vm0 = vcmask (!%p193_p9), 556032  }
   0xe   : > { %196 = sbr.rel (%p193_p9) target bundleno = 614 (0x266), region = 40  ;;  %356 = vmatprep.subr.bf16.mxu0 (!%p193_p9), %v693_v1  ;;  %p222_p10 = scmp.lt.s32.totalorder (!%p193_p9), %s534_s9, 3  ;;  %v612_v4 = vld [vmem:[%s886_s1 + $0x18] sm:$0xff] (!%p193_p9)   ;;  %v613_v6 = vld [vmem:[%s886_s1 + $0x20] sm:$0xff] (!%p193_p9)   ;;  %v614_v7 = vld [vmem:[%s886_s1 + $0x28] sm:$0xff] (!%p193_p9)   ;;  %vm352_vm1 = vcmask (!%p193_p9), 1041408  }
   0xf   : > { %357 = vmatpush1.bf16.msra.mxu0 (!%p193_p9), %v609_v0  ;;  %v615_v8 = vld [vmem:[%s886_s1 + $0x30] sm:$0xff] (!%p193_p9)   ;;  %v616_v9 = vld [vmem:[%s886_s1 + $0x38] sm:$0xff] (!%p193_p9)   ;;  %v617_v10 = vld [vmem:[%s886_s1 + $0x40] sm:$0xff] (!%p193_p9)   ;;  %vm397_vm2 = vcmask (!%p193_p9), 261120   ;;  %s218_s8 = sand.u32 (!%p193_p9), 1, %s683_s19   ;;  %vm450_vm3 = vcmask (!%p193_p9), 257024  }
  0x10   : > { %358 = vmatprep.subr.bf16.mxu0 (!%p193_p9), %v693_v1  ;;  %v618_v11 = vld [vmem:[%s886_s1 + $0x48] sm:$0xff] (!%p193_p9)   ;;  %v619_v12 = vld [vmem:[%s886_s1 + $0x50] sm:$0xff] (!%p193_p9)   ;;  %v620_v13 = vld [vmem:[%s886_s1 + $0x58] sm:$0xff] (!%p193_p9)   ;;  %s533_s11 = sshll.u32 (!%p193_p9), %s218_s8, 3  ;;  %s844_s25 = scalar_lea.sflag (!%p193_p9), [#allocation3], %s218_s8 }
  0x11   : > { %v621_v14 = vld [vmem:[%s886_s1 + $0x60] ss:$0 sps:$4 sm:$0x33] (!%p193_p9)   ;;  %s220_s13 = scalar_lea.vmem (!%p193_p9), [#allocation2], %s533_s11 }
  0x12   : > { %v354_v15 = vsel (!%p193_p9), %vm352_vm1, %v621_v14, 0  ;;  %v537_v17 = vld [vmem:[%s887_s2] ss:$0 sm:$0xff] (!%p193_p9)  ;;  %s467_s14 = sshll.u32 (!%p193_p9), %s220_s13, 4  ;;  %s842_s14 = int_to_ptr.vmem [resolvable:$true] %s467_s14 }
  0x13   : > { %359 = vmatpush1.bf16.msra.mxu0 (!%p193_p9), %v610_v2  ;;  %v554_v43 = vld [vmem:[%s888_s3] ss:$0 sm:$0xff] (!%p193_p9)  ;;  %s629_s26 = scalar_lea.vmem (!%p193_p9), %s842_s14, 128 }
  0x14   : > { %360 = vmatprep.subr.bf16.mxu0 (!%p193_p9), %v693_v1  ;;  %v555_v45 = vld [vmem:[%s889_s4] ss:$0 sm:$0xff] (!%p193_p9)  ;;  %p630_p11 = scmp.ne.s32.totalorder (!%p193_p9), %s842_s14, %s629_s26 }
  0x15   : > { %s898_s9 = smov (!%p222_p10, %s534_s9), 3 }
  0x16   : > { %s563_s12 = sshll.u32 %s898_s9, 3  ;;  %p631_p12 = pnand %p630_p11, %p765_p5 }
  0x17   : > { %361 = vmatpush1.bf16.msra.mxu0 %v611_v3  ;;  %s791_s17 = scalar_lea.vmem %s885_s0, %s563_s12  ;;  %s566_s12 = sshll.u32 %s748_s22, 7 }
  0x18   : > { %362 = vmatprep.subr.bf16.mxu0 %v693_v1  ;;  %v624_v5 = vld [vmem:[%s791_s17 + $0x4] ss:$8 sps:$4 sm:$0xff]   ;;  %v622_v16 = vld [vmem:[%s791_s17] ss:$8 sps:$4 sm:$0xff]   ;;  %s840_s23 = scalar_lea.hbm %s890_s5, %s566_s12  ;;  %p632_p13 = pneg %p631_p12 }
  0x19   : > { %553 = vmatprep.mubr.msk.bf16.mxu0 %vm348_vm0, %v624_v5  ;;  %s694_s22 = smov [#allocation2]  }
  0x1a   : > { %s633_s30 = sshll.u32 %s694_s22, 4  ;;  %s634_s30 = int_to_ptr.vmem [resolvable:$false] %s633_s30 }
  0x1b   : > { %363 = vmatpush1.bf16.msra.mxu0 %v612_v4  ;;  %s635_s6 = scalar_lea.vmem %s634_s30, 256  ;;  %p636_p0 = scmp.lt.s32.totalorder %s842_s14, %s634_s30 }
  0x1c   : > { %364 = vmatprep.subr.bf16.mxu0 %v693_v1  ;;  %p637_p1 = scmp.lt.s32.totalorder %s635_s6, %s629_s26 }
  0x1e   : > { %p638_p2 = por %p637_p1, %p636_p0 }
  0x1f   : > { %365 = vmatpush1.bf16.msra.mxu0 %v613_v6 }
  0x20   : > { %366 = vmatprep.subr.bf16.mxu0 %v693_v1  ;;  %p639_p3 = pnand %p638_p2, %p632_p13 }
  0x23   : > { %367 = vmatpush1.bf16.msra.mxu0 %v614_v7 }
  0x24   : > { %368 = vmatprep.subr.bf16.mxu0 %v693_v1 }
  0x27   : > { %369 = vmatpush1.bf16.msra.mxu0 %v615_v8 }
  0x28   : > { %370 = vmatprep.subr.bf16.mxu0 %v693_v1 }
  0x2b   : > { %371 = vmatpush1.bf16.msra.mxu0 %v616_v9 }
  0x2c   : > { %372 = vmatprep.subr.bf16.mxu0 %v693_v1 }
  0x2f   : > { %373 = vmatpush1.bf16.msra.mxu0 %v617_v10 }
  0x30   : > { %374 = vmatprep.subr.bf16.mxu0 %v693_v1 }
  0x33   : > { %375 = vmatpush1.bf16.msra.mxu0 %v618_v11 }
  0x34   : > { %376 = vmatprep.subr.bf16.mxu0 %v693_v1 }
  0x37   : > { %377 = vmatpush1.bf16.msra.mxu0 %v619_v12 }
  0x38   : > { %378 = vmatprep.subr.bf16.mxu0 %v693_v1 }
  0x3b   : > { %379 = vmatpush1.bf16.msra.mxu0 %v620_v13 }
  0x3c   : > { %380 = vmatprep.subr.bf16.mxu0 %v693_v1 }
  0x3f   : > { %381 = vmatpush1.bf16.msra.mxu0 %v354_v15 }
  0x42   : > { %389 = vmatmul.mubr.bf16.vlgmr.msra.gmra.mrb[0].mxu0 %v622_v16 }
 0x115   : > { %v390_v18 = vpop.f32.mrb[0].mxu0 }
 0x116   : > { %v391_v19 = vadd.f32 %v537_v17, %v390_v18  ;;  %v392_v20 = vpop.f32.mrb[1].mxu0 }
 0x117   : > { %v393_v21 = vpop.f32.mrb[2].mxu0 }
 0x118   : > { %v394_v22 = vadd.f32 %v537_v17, %v393_v21  ;;  %v395_v23 = vpop.f32.mrb[3].mxu0  ;;  %v398_v24 = vsel %vm397_vm2, %v391_v19, 0.0 }
 0x119   : > { %399 = vadd.xlane.f32.xlu0 %v398_v24 }
 0x11a   : > { %v401_v25 = vsel %vm397_vm2, %v394_v22, 0.0 }
 0x11d   : > { %402 = vadd.xlane.f32.xlu0 %v401_v25 }
 0x1a6   : > { %v400_v26 = vpop.xlane.xlu0 %399 }
 0x1a7   : > { %v404_v27 = vmul.f32 0.03125, %v400_v26 }
 0x1a9   : > { %v406_v28 = vsub.f32 %v391_v19, %v404_v27 }
 0x1aa   : > { %v403_v29 = vpop.xlane.xlu0 %402 }
 0x1ab   : > { %v405_v30 = vmul.f32 0.03125, %v403_v29  ;;  %v408_v31 = vmul.f32 %v406_v28, %v406_v28 }
 0x1ad   : > { %v407_v32 = vsub.f32 %v394_v22, %v405_v30  ;;  %v410_v33 = vsel %vm397_vm2, %v408_v31, 0.0 }
 0x1ae   : > { %411 = vadd.xlane.f32.xlu1 %v410_v33 }
 0x1af   : > { %v409_v34 = vmul.f32 %v407_v32, %v407_v32 }
 0x1b1   : > { %v413_v35 = vsel %vm397_vm2, %v409_v34, 0.0 }
 0x1b2   : > { %414 = vadd.xlane.f32.xlu1 %v413_v35 }
 0x23b   : > { %v412_v36 = vpop.xlane.xlu1 %411 }
 0x23c   : > { %v416_v37 = vmul.f32 0.03125, %v412_v36 }
 0x23e   : > { %v418_v38 = vadd.f32 1e-05, %v416_v37 }
 0x23f   : > { %v415_v39 = vpop.xlane.xlu1 %414 }
 0x240   : > { %625 = vrsqrt.f32 %v418_v38  ;;  %v417_v40 = vmul.f32 0.03125, %v415_v39 }
 0x242   : > { %v419_v41 = vadd.f32 1e-05, %v417_v40 }
 0x244   : > { %627 = vrsqrt.f32 %v419_v41 }
 0x24a   : > { %v626_v42 = vpop.eup %625 }
 0x24b   : > { %v422_v44 = vmul.f32 %v626_v42, %v406_v28 }
 0x24d   : > { %v431_v46 = vmul.f32 %v554_v43, %v422_v44 }
 0x24e   : > { %v628_v47 = vpop.eup %627 }
 0x24f   : > { %v440_v48 = vadd.f32 %v555_v45, %v431_v46  ;;  %v423_v49 = vmul.f32 %v628_v47, %v407_v32 }
 0x251   : > { %v432_v50 = vmul.f32 %v554_v43, %v423_v49  ;;  %v564_v51 = vpack.c.bf16 %v440_v48, %v440_v48 }
 0x253   : > { %v441_v52 = vadd.f32 %v555_v45, %v432_v50  ;;  %451 = vst.msk [vmem:[%s220_s13] sm:$0xf] %vm450_vm3, %v564_v51 }
 0x255   : > { %v565_v53 = vpack.c.bf16 %v441_v52, %v441_v52 }
 0x257   : > { %452 = vst.msk [vmem:[%s220_s13 + $0x4] sm:$0xf] %vm450_vm3, %v565_v53 }
 0x258   : > { %642 = shalt.err (!%p639_p3)
}
 0x259   : > { %s643_s17 = scalar_lea.hbm %s840_s23, 128  ;;  %s647_s9 = scalar_lea.hbm %s890_s5, 256 }
 0x25a   : > { %p644_p4 = scmp.ne.s32.totalorder %s840_s23, %s643_s17  ;;  %p648_p9 = scmp.lt.u32.totalorder %s840_s23, %s890_s5 }
 0x25b   : > { %p649_p10 = scmp.lt.u32.totalorder %s647_s9, %s643_s17  ;;  %p651_p12 = scmp.lt.u32.totalorder %s643_s17, %s840_s23 }
 0x25c   : > { %p645_p7 = pnand %p644_p4, %p765_p5 }
 0x25d   : > { %p650_p11 = por %p649_p10, %p648_p9 }
 0x25e   : > { %p646_p8 = pneg %p645_p7 }
 0x25f   : > { %p652_p13 = por %p651_p12, %p650_p11 }
 0x261   : > { %p653_p0 = pnand %p652_p13, %p646_p8 }
 0x263   : > { %656 = shalt.err (!%p653_p0)
}
 0x264   : > { %s695_s12 = smov 64   ;;  %s696_s13 = smov 4  }
 0x265   : > { %567 = dma.vmem_to_hbm [thread:$0]  (%p765_p5), %s842_s14, 128, %s840_s23, %s844_s25, %s695_s12, %s695_s12, %s696_s13  }
 0x266 PF: > { %p573_p1 = scmp.ge.s32.totalorder %s691_s21, 2  ;;  %s482_s15 = sand.u32 1, %s679_s18  }
 0x267   : > { %s483_s16 = scalar_lea.sflag [#allocation3], %s482_s15 }
 0x268   : > { %p570_p2 = pnand %p573_p1, %p769_p6 }
 0x26a   : > { %674 = dma.done.wait (!%p570_p2), %s483_s16, 128  }
 0x26b   : > { %676 = vsyncadd (!%p570_p2), %s483_s16, 4294967168  ;;  %p15_p3 = scmp.ge.s32.totalorder %s752_s24, 4   ;;  %s893_s18 = smov %s683_s19 }
 0x26c   : > { %s894_s19 = smov %s687_s20  ;;  %s895_s20 = smov %s763_s27 }
 0x26d   : > { %s896_s21 = smov %s752_s24  ;;  %17 = sbr.rel (!%p15_p3) target bundleno = 3 (0x3), region = 75 }
 0x274   :  { %488 = vsyncpa [#allocation3], 1 }
 0x275   :  { %490 = vsyncpa [#allocation3 + $0x1], 1 }

// kernel: tpu_custom_call.1
= control target key start
LH: loop header
LB: loop body
LE: loop exit
PB: predicated region body
PF: predicated region fallthrough
CT: control target
= control target key end

     0   :  { %10 = vsyncpa [#allocation3], 0  ;;  %s885_s0 = inlined_call_operand.vmem [shape: bf16[32,196], index: 0, kind: input, shape index: {}]   ;;  %s886_s1 = inlined_call_operand.vmem [shape: bf16[196,32], index: 1, kind: input, shape index: {}]   ;;  %s887_s2 = inlined_call_operand.vmem [shape: f32[1,32], index: 2, kind: input, shape index: {}]   ;;  %s888_s3 = inlined_call_operand.vmem [shape: f32[1,32], index: 3, kind: input, shape index: {}]   ;;  %s889_s4 = inlined_call_operand.vmem [shape: f32[1,32], index: 4, kind: input, shape index: {}]   ;;  %s890_s5 = inlined_call_operand.hbm [shape: bf16[32,32], index: 5, kind: output, shape index: {}]  }
   0x1   :  { %12 = vsyncpa [#allocation3 + $0x1], 0  ;;  %s727_s18 = smov 0   ;;  %s729_s19 = smov 0  }
   0x2   :  { %s731_s20 = smov 0   ;;  %s733_s21 = smov 0  }
   0x3 LB: > { %s748_s22 = sadd.s32 4294967295, %s691_s21   ;;  %s529_s23 = sadd.s32 4294967294, %s691_s21   ;;  %s691_s21 = sphi %s733_s21, %s896_s21   ;;  %s687_s20 = sphi %s731_s20, %s895_s20   ;;  %s683_s19 = sphi %s729_s19, %s894_s19   ;;  %s679_s18 = sphi %s727_s18, %s893_s18  }
   0x4   : > { %s752_s24 = sadd.s32 1, %s691_s21   ;;  %s135_s25 = sadd.s32 1, %s687_s20 }
   0x5   : > { %s132_s26 = ssub.s32 %s691_s21, %s752_s24  ;;  %p145_p0 = scmp.ne.s32.totalorder %s687_s20, %s683_s19 }
   0x6   : > { %p133_p1 = scmp.eq.s32.totalorder %s132_s26, 0  ;;  %p146_p2 = scmp.eq.s32.totalorder %s748_s22, 1 }
   0x7   : > { %p151_p3 = scmp.ne.s32.totalorder %s683_s19, %s679_s18  ;;  %p152_p4 = scmp.eq.s32.totalorder %s529_s23, 1 }
   0x8   : > { %s763_s27 = scalar_select %p133_p1, %s687_s20, %s135_s25  }
   0x9   : > { %p765_p5 = por %p146_p2, %p145_p0  ;;  %p769_p6 = por %p152_p4, %p151_p3 }
   0xa   : > { %p532_p7 = scmp.ge.s32.totalorder %s691_s21, 1  ;;  %p192_p8 = scmp.lt.s32.totalorder %s691_s21, 3 }
   0xc   : > { %p193_p9 = pnand %p532_p7, %p192_p8 }
   0xd   : > { %v609_v0 = vld [vmem:[%s886_s1] sm:$0xff] (!%p193_p9)   ;;  %v693_v1 = vmov (!%p193_p9), 0   ;;  %v610_v2 = vld [vmem:[%s886_s1 + $0x8] sm:$0xff] (!%p193_p9)   ;;  %s534_s9 = sshll.u32 (!%p193_p9), %s748_s22, 1  ;;  %v611_v3 = vld [vmem:[%s886_s1 + $0x10] sm:$0xff] (!%p193_p9)   ;;  %vm348_vm0 = vcmask (!%p193_p9), 556032  }
   0xe   : > { %196 = sbr.rel (%p193_p9) target bundleno = 614 (0x266), region = 40  ;;  %356 = vmatprep.subr.bf16.mxu0 (!%p193_p9), %v693_v1  ;;  %p222_p10 = scmp.lt.s32.totalorder (!%p193_p9), %s534_s9, 3  ;;  %v612_v4 = vld [vmem:[%s886_s1 + $0x18] sm:$0xff] (!%p193_p9)   ;;  %v613_v6 = vld [vmem:[%s886_s1 + $0x20] sm:$0xff] (!%p193_p9)   ;;  %v614_v7 = vld [vmem:[%s886_s1 + $0x28] sm:$0xff] (!%p193_p9)   ;;  %vm352_vm1 = vcmask (!%p193_p9), 1041408  }
   0xf   : > { %357 = vmatpush1.bf16.msra.mxu0 (!%p193_p9), %v609_v0  ;;  %v615_v8 = vld [vmem:[%s886_s1 + $0x30] sm:$0xff] (!%p193_p9)   ;;  %v616_v9 = vld [vmem:[%s886_s1 + $0x38] sm:$0xff] (!%p193_p9)   ;;  %v617_v10 = vld [vmem:[%s886_s1 + $0x40] sm:$0xff] (!%p193_p9)   ;;  %vm397_vm2 = vcmask (!%p193_p9), 261120   ;;  %s218_s8 = sand.u32 (!%p193_p9), 1, %s683_s19   ;;  %vm450_vm3 = vcmask (!%p193_p9), 257024  }
  0x10   : > { %358 = vmatprep.subr.bf16.mxu0 (!%p193_p9), %v693_v1  ;;  %v618_v11 = vld [vmem:[%s886_s1 + $0x48] sm:$0xff] (!%p193_p9)   ;;  %v619_v12 = vld [vmem:[%s886_s1 + $0x50] sm:$0xff] (!%p193_p9)   ;;  %v620_v13 = vld [vmem:[%s886_s1 + $0x58] sm:$0xff] (!%p193_p9)   ;;  %s533_s11 = sshll.u32 (!%p193_p9), %s218_s8, 3  ;;  %s844_s25 = scalar_lea.sflag (!%p193_p9), [#allocation3], %s218_s8 }
  0x11   : > { %v621_v14 = vld [vmem:[%s886_s1 + $0x60] ss:$0 sps:$4 sm:$0x33] (!%p193_p9)   ;;  %s220_s13 = scalar_lea.vmem (!%p193_p9), [#allocation2], %s533_s11 }
  0x12   : > { %v354_v15 = vsel (!%p193_p9), %vm352_vm1, %v621_v14, 0  ;;  %v537_v17 = vld [vmem:[%s887_s2] ss:$0 sm:$0xff] (!%p193_p9)  ;;  %s467_s14 = sshll.u32 (!%p193_p9), %s220_s13, 4  ;;  %s842_s14 = int_to_ptr.vmem [resolvable:$true] %s467_s14 }
  0x13   : > { %359 = vmatpush1.bf16.msra.mxu0 (!%p193_p9), %v610_v2  ;;  %v554_v43 = vld [vmem:[%s888_s3] ss:$0 sm:$0xff] (!%p193_p9)  ;;  %s629_s26 = scalar_lea.vmem (!%p193_p9), %s842_s14, 128 }
  0x14   : > { %360 = vmatprep.subr.bf16.mxu0 (!%p193_p9), %v693_v1  ;;  %v555_v45 = vld [vmem:[%s889_s4] ss:$0 sm:$0xff] (!%p193_p9)  ;;  %p630_p11 = scmp.ne.s32.totalorder (!%p193_p9), %s842_s14, %s629_s26 }
  0x15   : > { %s898_s9 = smov (!%p222_p10, %s534_s9), 3 }
  0x16   : > { %s563_s12 = sshll.u32 %s898_s9, 3  ;;  %p631_p12 = pnand %p630_p11, %p765_p5 }
  0x17   : > { %361 = vmatpush1.bf16.msra.mxu0 %v611_v3  ;;  %s791_s17 = scalar_lea.vmem %s885_s0, %s563_s12  ;;  %s566_s12 = sshll.u32 %s748_s22, 7 }
  0x18   : > { %362 = vmatprep.subr.bf16.mxu0 %v693_v1  ;;  %v624_v5 = vld [vmem:[%s791_s17 + $0x4] ss:$8 sps:$4 sm:$0xff]   ;;  %v622_v16 = vld [vmem:[%s791_s17] ss:$8 sps:$4 sm:$0xff]   ;;  %s840_s23 = scalar_lea.hbm %s890_s5, %s566_s12  ;;  %p632_p13 = pneg %p631_p12 }
  0x19   : > { %553 = vmatprep.mubr.msk.bf16.mxu0 %vm348_vm0, %v624_v5  ;;  %s694_s22 = smov [#allocation2]  }
  0x1a   : > { %s633_s30 = sshll.u32 %s694_s22, 4  ;;  %s634_s30 = int_to_ptr.vmem [resolvable:$false] %s633_s30 }
  0x1b   : > { %363 = vmatpush1.bf16.msra.mxu0 %v612_v4  ;;  %s635_s6 = scalar_lea.vmem %s634_s30, 256  ;;  %p636_p0 = scmp.lt.s32.totalorder %s842_s14, %s634_s30 }
  0x1c   : > { %364 = vmatprep.subr.bf16.mxu0 %v693_v1  ;;  %p637_p1 = scmp.lt.s32.totalorder %s635_s6, %s629_s26 }
  0x1e   : > { %p638_p2 = por %p637_p1, %p636_p0 }
  0x1f   : > { %365 = vmatpush1.bf16.msra.mxu0 %v613_v6 }
  0x20   : > { %366 = vmatprep.subr.bf16.mxu0 %v693_v1  ;;  %p639_p3 = pnand %p638_p2, %p632_p13 }
  0x23   : > { %367 = vmatpush1.bf16.msra.mxu0 %v614_v7 }
  0x24   : > { %368 = vmatprep.subr.bf16.mxu0 %v693_v1 }
  0x27   : > { %369 = vmatpush1.bf16.msra.mxu0 %v615_v8 }
  0x28   : > { %370 = vmatprep.subr.bf16.mxu0 %v693_v1 }
  0x2b   : > { %371 = vmatpush1.bf16.msra.mxu0 %v616_v9 }
  0x2c   : > { %372 = vmatprep.subr.bf16.mxu0 %v693_v1 }
  0x2f   : > { %373 = vmatpush1.bf16.msra.mxu0 %v617_v10 }
  0x30   : > { %374 = vmatprep.subr.bf16.mxu0 %v693_v1 }
  0x33   : > { %375 = vmatpush1.bf16.msra.mxu0 %v618_v11 }
  0x34   : > { %376 = vmatprep.subr.bf16.mxu0 %v693_v1 }
  0x37   : > { %377 = vmatpush1.bf16.msra.mxu0 %v619_v12 }
  0x38   : > { %378 = vmatprep.subr.bf16.mxu0 %v693_v1 }
  0x3b   : > { %379 = vmatpush1.bf16.msra.mxu0 %v620_v13 }
  0x3c   : > { %380 = vmatprep.subr.bf16.mxu0 %v693_v1 }
  0x3f   : > { %381 = vmatpush1.bf16.msra.mxu0 %v354_v15 }
  0x42   : > { %389 = vmatmul.mubr.bf16.vlgmr.msra.gmra.mrb[0].mxu0 %v622_v16 }
 0x115   : > { %v390_v18 = vpop.f32.mrb[0].mxu0 }
 0x116   : > { %v391_v19 = vadd.f32 %v537_v17, %v390_v18  ;;  %v392_v20 = vpop.f32.mrb[1].mxu0 }
 0x117   : > { %v393_v21 = vpop.f32.mrb[2].mxu0 }
 0x118   : > { %v394_v22 = vadd.f32 %v537_v17, %v393_v21  ;;  %v395_v23 = vpop.f32.mrb[3].mxu0  ;;  %v398_v24 = vsel %vm397_vm2, %v391_v19, 0.0 }
 0x119   : > { %399 = vadd.xlane.f32.xlu0 %v398_v24 }
 0x11a   : > { %v401_v25 = vsel %vm397_vm2, %v394_v22, 0.0 }
 0x11d   : > { %402 = vadd.xlane.f32.xlu0 %v401_v25 }
 0x1a6   : > { %v400_v26 = vpop.xlane.xlu0 %399 }
 0x1a7   : > { %v404_v27 = vmul.f32 0.03125, %v400_v26 }
 0x1a9   : > { %v406_v28 = vsub.f32 %v391_v19, %v404_v27 }
 0x1aa   : > { %v403_v29 = vpop.xlane.xlu0 %402 }
 0x1ab   : > { %v405_v30 = vmul.f32 0.03125, %v403_v29  ;;  %v408_v31 = vmul.f32 %v406_v28, %v406_v28 }
 0x1ad   : > { %v407_v32 = vsub.f32 %v394_v22, %v405_v30  ;;  %v410_v33 = vsel %vm397_vm2, %v408_v31, 0.0 }
 0x1ae   : > { %411 = vadd.xlane.f32.xlu1 %v410_v33 }
 0x1af   : > { %v409_v34 = vmul.f32 %v407_v32, %v407_v32 }
 0x1b1   : > { %v413_v35 = vsel %vm397_vm2, %v409_v34, 0.0 }
 0x1b2   : > { %414 = vadd.xlane.f32.xlu1 %v413_v35 }
 0x23b   : > { %v412_v36 = vpop.xlane.xlu1 %411 }
 0x23c   : > { %v416_v37 = vmul.f32 0.03125, %v412_v36 }
 0x23e   : > { %v418_v38 = vadd.f32 1e-05, %v416_v37 }
 0x23f   : > { %v415_v39 = vpop.xlane.xlu1 %414 }
 0x240   : > { %625 = vrsqrt.f32 %v418_v38  ;;  %v417_v40 = vmul.f32 0.03125, %v415_v39 }
 0x242   : > { %v419_v41 = vadd.f32 1e-05, %v417_v40 }
 0x244   : > { %627 = vrsqrt.f32 %v419_v41 }
 0x24a   : > { %v626_v42 = vpop.eup %625 }
 0x24b   : > { %v422_v44 = vmul.f32 %v626_v42, %v406_v28 }
 0x24d   : > { %v431_v46 = vmul.f32 %v554_v43, %v422_v44 }
 0x24e   : > { %v628_v47 = vpop.eup %627 }
 0x24f   : > { %v440_v48 = vadd.f32 %v555_v45, %v431_v46  ;;  %v423_v49 = vmul.f32 %v628_v47, %v407_v32 }
 0x251   : > { %v432_v50 = vmul.f32 %v554_v43, %v423_v49  ;;  %v564_v51 = vpack.c.bf16 %v440_v48, %v440_v48 }
 0x253   : > { %v441_v52 = vadd.f32 %v555_v45, %v432_v50  ;;  %451 = vst.msk [vmem:[%s220_s13] sm:$0xf] %vm450_vm3, %v564_v51 }
 0x255   : > { %v565_v53 = vpack.c.bf16 %v441_v52, %v441_v52 }
 0x257   : > { %452 = vst.msk [vmem:[%s220_s13 + $0x4] sm:$0xf] %vm450_vm3, %v565_v53 }
 0x258   : > { %642 = shalt.err (!%p639_p3)
}
 0x259   : > { %s643_s17 = scalar_lea.hbm %s840_s23, 128  ;;  %s647_s9 = scalar_lea.hbm %s890_s5, 256 }
 0x25a   : > { %p644_p4 = scmp.ne.s32.totalorder %s840_s23, %s643_s17  ;;  %p648_p9 = scmp.lt.u32.totalorder %s840_s23, %s890_s5 }
 0x25b   : > { %p649_p10 = scmp.lt.u32.totalorder %s647_s9, %s643_s17  ;;  %p651_p12 = scmp.lt.u32.totalorder %s643_s17, %s840_s23 }
 0x25c   : > { %p645_p7 = pnand %p644_p4, %p765_p5 }
 0x25d   : > { %p650_p11 = por %p649_p10, %p648_p9 }
 0x25e   : > { %p646_p8 = pneg %p645_p7 }
 0x25f   : > { %p652_p13 = por %p651_p12, %p650_p11 }
 0x261   : > { %p653_p0 = pnand %p652_p13, %p646_p8 }
 0x263   : > { %656 = shalt.err (!%p653_p0)
}
 0x264   : > { %s695_s12 = smov 64   ;;  %s696_s13 = smov 4  }
 0x265   : > { %567 = dma.vmem_to_hbm [thread:$0]  (%p765_p5), %s842_s14, 128, %s840_s23, %s844_s25, %s695_s12, %s695_s12, %s696_s13  }
 0x266 PF: > { %p573_p1 = scmp.ge.s32.totalorder %s691_s21, 2  ;;  %s482_s15 = sand.u32 1, %s679_s18  }
 0x267   : > { %s483_s16 = scalar_lea.sflag [#allocation3], %s482_s15 }
 0x268   : > { %p570_p2 = pnand %p573_p1, %p769_p6 }
 0x26a   : > { %674 = dma.done.wait (!%p570_p2), %s483_s16, 128  }
 0x26b   : > { %676 = vsyncadd (!%p570_p2), %s483_s16, 4294967168  ;;  %p15_p3 = scmp.ge.s32.totalorder %s752_s24, 4   ;;  %s893_s18 = smov %s683_s19 }
 0x26c   : > { %s894_s19 = smov %s687_s20  ;;  %s895_s20 = smov %s763_s27 }
 0x26d   : > { %s896_s21 = smov %s752_s24  ;;  %17 = sbr.rel (!%p15_p3) target bundleno = 3 (0x3), region = 75 }
 0x274   :  { %488 = vsyncpa [#allocation3], 1 }
 0x275   :  { %490 = vsyncpa [#allocation3 + $0x1], 1 }

</bundles_post_ra>
